<compile_context>
chip_gen: v7x
topology: tpu7x:2x2x1
jax: 0.10.0
libtpu: 0.0.40
codegen_flags: <defaults>
</compile_context>

<pallas_src>
import functools

import jax
import jax.numpy as jnp
from jax import lax
from jax.experimental import pallas as pl
from jax.experimental.pallas import tpu as pltpu

_MB = 1024 * 1024


def _round_up(x, m):
    return ((x + m - 1) // m) * m


def _vmem_capacity_bytes():
    try:
        return int(pltpu.get_tpu_info().vmem_capacity_bytes)
    except Exception:
        return 64 * _MB  # conservative fallback (v7x per-core VMEM)


# Finite "-inf": exp underflows to exactly 0.0 so p*logits stays finite (f32 only).
_NEG_BIG = -1e30


def _online_update(logits, j, ids_ref, m_sc, s_sc, p_sc, t_sc,
                   inv_temperature, vocab_size, tv, vocab_padded):
    """One online-softmax update with a (tm, tv) f32 logits tile."""
    if inv_temperature != 1.0:
        logits = logits * inv_temperature

    # Local column indices 0..tv-1; compare against (ids - j*tv) and mask with
    # (V - j*tv) so we never build a full (tm, tv) global-index tile.
    col = lax.broadcasted_iota(jnp.int32, logits.shape, 1)
    if vocab_padded:
        # Only traced when the vocab axis was actually padded; applied BEFORE
        # max/exp/gather so padded columns never reach the accumulators.
        logits = jnp.where(col < (vocab_size - j * tv), logits, _NEG_BIG)

    # Gather the target-token logit via a one-hot compare + reduce.
    ids_local = ids_ref[...] - j * tv          # (tm, 1) int32
    t_sc[...] += jnp.sum(jnp.where(col == ids_local, logits, 0.0),
                         axis=-1, keepdims=True)

    # Online softmax statistics: running max, sum(exp), sum(exp * logit).
    m_new = jnp.maximum(m_sc[...], logits.max(axis=-1, keepdims=True))
    alpha = jnp.exp(m_sc[...] - m_new)
    p = jnp.exp(logits - m_new)
    s_sc[...] = alpha * s_sc[...] + p.sum(axis=-1, keepdims=True)
    p_sc[...] = alpha * p_sc[...] + (p * logits).sum(axis=-1, keepdims=True)
    m_sc[...] = m_new


def _finalize(logp_ref, ent_ref, m_sc, s_sc, p_sc, t_sc):
    lse = m_sc[...] + jnp.log(s_sc[...])
    inv_s = pl.reciprocal(s_sc[...], approx=False)
    logp_ref[...] = (t_sc[...] - lse).astype(logp_ref.dtype)
    ent_ref[...] = (lse - p_sc[...] * inv_s).astype(ent_ref.dtype)


def _make_kernel(inv_temperature, vocab_size, tv, vocab_padded, split_k):
    if split_k:
        # Grid (i, j, k): k (hidden-dim chunks) innermost; the (tm, tv) logits tile
        # is accumulated in a f32 VMEM scratch and the softmax epilogue runs on the
        # last k step.  This keeps tile sizes independent of H (v7x / 64 MiB VMEM).
        def kernel(ids_ref, h_ref, w_ref, logp_ref, ent_ref,
                   acc_ref, m_sc, s_sc, p_sc, t_sc):
            j = pl.program_id(1)
            k = pl.program_id(2)

            @pl.when(jnp.logical_and(j == 0, k == 0))
            def _():
                m_sc[...] = jnp.full_like(m_sc, _NEG_BIG)
                s_sc[...] = jnp.zeros_like(s_sc)
                p_sc[...] = jnp.zeros_like(p_sc)
                t_sc[...] = jnp.zeros_like(t_sc)

            @pl.when(k == 0)
            def _():
                acc_ref[...] = jnp.zeros_like(acc_ref)

            # Both operands contract over their last (lane) dim in stored layout
            # -> no transpose / relayout of the (tv, tk) weight tile.
            acc_ref[...] += lax.dot_general(
                h_ref[...], w_ref[...],
                dimension_numbers=(((1,), (1,)), ((), ())),
                preferred_element_type=jnp.float32,
            )

            @pl.when(k == pl.num_programs(2) - 1)
            def _():
                _online_update(acc_ref[...], j, ids_ref, m_sc, s_sc, p_sc, t_sc,
                               inv_temperature, vocab_size, tv, vocab_padded)

                @pl.when(j == pl.num_programs(1) - 1)
                def _():
                    _finalize(logp_ref, ent_ref, m_sc, s_sc, p_sc, t_sc)

    else:
        # No contraction split (tk == H): hidden row tile stays resident in VMEM
        # across the whole vocab sweep (index map constant in j, k).
        def kernel(ids_ref, h_ref, w_ref, logp_ref, ent_ref,
                   m_sc, s_sc, p_sc, t_sc):
            j = pl.program_id(1)

            @pl.when(j == 0)
            def _():
                m_sc[...] = jnp.full_like(m_sc, _NEG_BIG)
                s_sc[...] = jnp.zeros_like(s_sc)
                p_sc[...] = jnp.zeros_like(p_sc)
                t_sc[...] = jnp.zeros_like(t_sc)

            logits = lax.dot_general(
                h_ref[...], w_ref[...],
                dimension_numbers=(((1,), (1,)), ((), ())),
                preferred_element_type=jnp.float32,
            )

            _online_update(logits, j, ids_ref, m_sc, s_sc, p_sc, t_sc,
                           inv_temperature, vocab_size, tv, vocab_padded)

            @pl.when(j == pl.num_programs(1) - 1)
            def _():
                _finalize(logp_ref, ent_ref, m_sc, s_sc, p_sc, t_sc)

    return kernel


def fused_linear_for_ppo(hidden_states, vocab_weights, input_ids,
                         temperature=1.0, tm=None, tv=None, tk=None):
    """Forward pass of FusedLinearForPPO. Returns (token_log_probs, entropy)."""
    orig_ndim = hidden_states.ndim
    orig_dtype = hidden_states.dtype
    assert orig_ndim in (2, 3)

    if orig_ndim == 3:
        B, S, H = hidden_states.shape
        hidden = hidden_states.reshape(B * S, H)
        ids = input_ids.reshape(B * S)
    else:
        hidden = hidden_states
        ids = input_ids

    T, H = hidden.shape
    V, Hw = vocab_weights.shape
    assert H == Hw

    h_isz = jnp.dtype(hidden.dtype).itemsize
    w_isz = jnp.dtype(vocab_weights.dtype).itemsize
    itemsize = max(h_isz, w_isz)
    # Sub-32-bit dtypes pack 2+ rows per sublane group: align rows to 16 for bf16/fp8.
    row_align = 8 if h_isz >= 4 else 16

    # --- VMEM budget: raise the scoped limit (defaults are 16/32 MiB) toward the
    # physical capacity of the chip, then size the tiles against an explicit model
    # that includes the Mosaic (tm, tv) f32 elementwise temporaries.
    cap = _vmem_capacity_bytes()
    vmem_limit = int(max(32 * _MB, min(cap - 12 * _MB, int(cap * 0.85))))
    budget = int(vmem_limit * 0.90)

    Ta = _round_up(T, row_align)
    Va = _round_up(V, 128)

    # Requested / default tiles.  tm is the dominant lever (weight HBM traffic =
    # ceil(T/tm)*V*H*bytes): 1024 for bf16, ~1536 for f32.  tv: 1024 on 128 MiB
    # chips, 512 on 64 MiB chips; any 128-multiple is allowed (no divisibility rule).
    tm_req = tm if tm is not None else (1536 if itemsize >= 4 else 1024)
    tv_req = tv if tv is not None else (1024 if cap >= 96 * _MB else 512)

    tm_ = _round_up(min(tm_req, Ta), row_align)
    tv_ = max(128, (min(tv_req, Va) // 128) * 128)

    # Megacore: on 2-TensorCore chips (64 MiB VMEM/core) keep >= 2 row tiles so the
    # 'parallel' row axis gives both cores work.
    if cap <= 64 * _MB and Ta <= tm_ and Ta >= 2 * row_align:
        tm_ = _round_up((Ta + 1) // 2, row_align)

    def vmem_need(tm_b, tv_b, tk_b, split_b):
        lane = 128
        need = 2 * (tm_b * tk_b + tv_b * tk_b) * itemsize   # double-buffered matmul tiles
        need += 2 * tm_b * lane * 4                         # ids (tm,1) i32, lane-padded
        need += 4 * tm_b * tv_b * 4                         # f32 temporaries on the (tm,tv) tile
        need += (tm_b * tv_b * 4) if split_b else 0         # logits accumulator scratch
        need += 4 * tm_b * lane * 4                         # four (tm,1) f32 scratches
        need += 2 * 2 * tm_b * lane * 4                     # two (tm,1) outputs
        return need

    def shrink_to_fit(tm_b, tv_b, tk_b, split_b):
        while vmem_need(tm_b, tv_b, tk_b, split_b) > budget:
            if tv_b > 256:
                tv_b = max(256, ((tv_b // 2) // 128) * 128)
            elif tm_b > row_align:
                tm_b = max(row_align, _round_up(tm_b // 2, row_align))
            elif tv_b > 128:
                tv_b = 128
            else:
                break
        return tm_b, tv_b

    # First try without splitting the contraction dim.
    tk_ = H
    split = False
    tm_, tv_ = shrink_to_fit(tm_, tv_, tk_, False)

    def dividing_tk(limit):
        hi = min(limit, H - 128)
        hi -= hi % 128
        for c in range(hi, 127, -128):
            if H % c == 0:
                return c
        return 0

    if tk is not None and 0 < tk < H and H % tk == 0 and tk % 128 == 0:
        # Explicit contraction tile: force the split path (also used by the tests).
        tk_ = tk
        split = True
        tm_ = _round_up(min(tm_req, Ta), row_align)
        tv_ = max(128, (min(tv_req, Va) // 128) * 128)
        tm_, tv_ = shrink_to_fit(tm_, tv_, tk_, True)
    elif H >= 2048 and (tm_ < _round_up(min(tm_req, Ta), row_align) or tv_ < 256):
        # VMEM forced the tiles down (big H on a small-VMEM chip): consider splitting
        # the contraction dim so tile sizes no longer scale with H.
        tk_c = dividing_tk(2048)
        if tk_c:
            tm2 = _round_up(min(tm_req, Ta), row_align)
            tv2 = max(128, (min(tv_req, Va) // 128) * 128)
            tm2, tv2 = shrink_to_fit(tm2, tv2, tk_c, True)
            # HBM traffic per logit column: no-split ~ 1/tm (hidden resident),
            # split ~ 1/tm + 1/tv (hidden re-streamed per vocab tile).
            if (1.0 / tm2 + 1.0 / tv2) < 0.9 * (1.0 / tm_):
                tm_, tv_, tk_, split = tm2, tv2, tk_c, True

    Tp = _round_up(T, tm_)
    Vp = _round_up(V, tv_)
    nk = (H // tk_) if split else 1

    # Only copy / pad when the shapes actually require it.  A ragged vocab is padded
    # once here and masked in-kernel (mask applied before max/exp/gather).
    hidden_p = hidden if Tp == T else (
        jnp.zeros((Tp, H), hidden.dtype).at[:T].set(hidden))
    weights_p = vocab_weights if Vp == V else (
        jnp.zeros((Vp, H), vocab_weights.dtype).at[:V].set(vocab_weights))
    ids2 = ids.astype(jnp.int32).reshape(T, 1)
    ids_p = ids2 if Tp == T else jnp.zeros((Tp, 1), jnp.int32).at[:T].set(ids2)

    grid = (Tp // tm_, Vp // tv_, nk)
    kernel = _make_kernel(float(1.0 / temperature), V, tv_, Vp != V, split)

    scratch = []
    if split:
        scratch.append(pltpu.VMEM((tm_, tv_), jnp.float32))  # logits accumulator
    scratch += [
        pltpu.VMEM((tm_, 1), jnp.float32),  # running max
        pltpu.VMEM((tm_, 1), jnp.float32),  # running sum(exp)
        pltpu.VMEM((tm_, 1), jnp.float32),  # running sum(exp * logit)
        pltpu.VMEM((tm_, 1), jnp.float32),  # target-token logit
    ]

    grid_rows = Tp // tm_
    hidden_passes = (Vp // tv_) if split else 1
    cost = pl.CostEstimate(
        flops=int(2 * T * V * H),
        transcendentals=int(T * V),
        bytes_accessed=int(grid_rows * Vp * H * w_isz
                           + hidden_passes * Tp * H * h_isz
                           + 3 * Tp * 4),
    )

    logp, ent = pl.pallas_call(
        kernel,
        out_shape=(
            jax.ShapeDtypeStruct((Tp, 1), orig_dtype),
            jax.ShapeDtypeStruct((Tp, 1), orig_dtype),
        ),
        grid_spec=pltpu.PrefetchScalarGridSpec(
            num_scalar_prefetch=0,
            grid=grid,
            in_specs=[
                pl.BlockSpec((tm_, 1), lambda i, j, k: (i, 0)),    # input_ids
                pl.BlockSpec((tm_, tk_), lambda i, j, k: (i, k)),  # hidden tile
                pl.BlockSpec((tv_, tk_), lambda i, j, k: (j, k)),  # vocab-weight tile
            ],
            out_specs=[
                pl.BlockSpec((tm_, 1), lambda i, j, k: (i, 0)),
                pl.BlockSpec((tm_, 1), lambda i, j, k: (i, 0)),
            ],
            scratch_shapes=scratch,
        ),
        compiler_params=pltpu.CompilerParams(
            dimension_semantics=("parallel", "arbitrary", "arbitrary"),
            vmem_limit_bytes=int(vmem_limit),
        ),
        cost_estimate=cost,
    )(ids_p, hidden_p, weights_p)

    logp = logp[:T, 0]
    ent = ent[:T, 0]
    if orig_ndim == 3:
        logp = logp.reshape(B, S)
        ent = ent.reshape(B, S)
    return logp, ent


# TODO(synk): backward pass (FusedLinearForPPOFunction.backward) is not implemented;
# only the forward semantics are reproduced here.


def _reference(hidden_states, vocab_weights, input_ids, temperature=1.0):
    h = hidden_states.astype(jnp.float32)
    w = vocab_weights.astype(jnp.float32)
    logits = h @ w.T / temperature
    log_probs = jax.nn.log_softmax(logits, axis=-1)
    probs = jax.nn.softmax(logits, axis=-1)
    token_log_probs = jnp.take_along_axis(
        log_probs, input_ids[..., None].astype(jnp.int32), axis=-1
    )[..., 0]
    entropy = jax.scipy.special.logsumexp(logits, axis=-1) - jnp.sum(
        probs * logits, axis=-1
    )
    return token_log_probs, entropy


if __name__ == "__main__":
    temperature = 0.7
    key = jax.random.PRNGKey(0)
    keys = jax.random.split(key, 12)

    # --- Test 1: small 3-D case (batch=2, seq=8, hidden=32, vocab=256). ---
    B, S, H, V = 2, 8, 32, 256
    hs = jax.random.normal(keys[0], (B, S, H), dtype=jnp.float32)
    vw = jax.random.normal(keys[1], (V, H), dtype=jnp.float32) * 0.05
    iid = jax.random.randint(keys[2], (B, S), 0, V, dtype=jnp.int32)

    fn = functools.partial(fused_linear_for_ppo, temperature=temperature)
    lp, en = jax.jit(fn)(hs, vw, iid)
    jax.block_until_ready((lp, en))
    rlp, ren = _reference(hs, vw, iid, temperature)
    assert jnp.allclose(lp.astype(jnp.float32), rlp, rtol=1e-4, atol=1e-4)
    assert jnp.allclose(en.astype(jnp.float32), ren, rtol=1e-4, atol=1e-4)

    # --- Test 2: 2-D, vocab NOT a multiple of the tile (ragged-vocab mask path,
    # non-dividing tv, multi-tile vocab grid). ---
    T2, H2, V2 = 16, 64, 1000
    hs2 = jax.random.normal(keys[3], (T2, H2), dtype=jnp.float32)
    vw2 = jax.random.normal(keys[4], (V2, H2), dtype=jnp.float32) * 0.05
    iid2 = jax.random.randint(keys[5], (T2,), 0, V2, dtype=jnp.int32)

    fn2 = functools.partial(fused_linear_for_ppo, temperature=temperature, tv=384)
    lp2, en2 = jax.jit(fn2)(hs2, vw2, iid2)
    jax.block_until_ready((lp2, en2))
    rlp2, ren2 = _reference(hs2, vw2, iid2, temperature)
    assert jnp.allclose(lp2.astype(jnp.float32), rlp2, rtol=1e-3, atol=1e-3)
    assert jnp.allclose(en2.astype(jnp.float32), ren2, rtol=1e-3, atol=1e-3)

    # --- Test 3: contraction (H) split path forced via tk, plus ragged vocab +
    # multi-tile vocab grid (grid = (rows, 2, 2)). ---
    T3, H3, V3 = 32, 256, 640
    hs3 = jax.random.normal(keys[6], (T3, H3), dtype=jnp.float32) * 0.2
    vw3 = jax.random.normal(keys[7], (V3, H3), dtype=jnp.float32) * 0.02
    iid3 = jax.random.randint(keys[8], (T3,), 0, V3, dtype=jnp.int32)

    fn3 = functools.partial(fused_linear_for_ppo, temperature=temperature,
                            tv=512, tk=128)
    lp3, en3 = jax.jit(fn3)(hs3, vw3, iid3)
    jax.block_until_ready((lp3, en3))
    rlp3, ren3 = _reference(hs3, vw3, iid3, temperature)
    assert jnp.allclose(lp3.astype(jnp.float32), rlp3, rtol=1e-3, atol=1e-3)
    assert jnp.allclose(en3.astype(jnp.float32), ren3, rtol=1e-3, atol=1e-3)

    # --- Test 4: bf16 inputs/outputs (16-row alignment + output cast path). ---
    B4, S4, H4, V4 = 2, 16, 64, 384
    hs4 = jax.random.normal(keys[9], (B4, S4, H4), dtype=jnp.bfloat16)
    vw4 = (jax.random.normal(keys[10], (V4, H4), dtype=jnp.float32) * 0.05
           ).astype(jnp.bfloat16)
    iid4 = jax.random.randint(keys[11], (B4, S4), 0, V4, dtype=jnp.int32)

    fn4 = functools.partial(fused_linear_for_ppo, temperature=temperature)
    lp4, en4 = jax.jit(fn4)(hs4, vw4, iid4)
    jax.block_until_ready((lp4, en4))
    rlp4, ren4 = _reference(hs4, vw4, iid4, temperature)
    assert jnp.allclose(lp4.astype(jnp.float32), rlp4, rtol=0.1, atol=0.1)
    assert jnp.allclose(en4.astype(jnp.float32), ren4, rtol=0.1, atol=0.1)

    print("KERNEL_OK")
</pallas_src>

<mosaic_0001>
module attributes {stable_mosaic.version = 11 : i64} {
  func.func @kernel(%arg0: i32, %arg1: i32, %arg2: i32, %arg3: memref<8x1xi32, #tpu.memory_space<vmem>>, %arg4: memref<8x32xf32, #tpu.memory_space<vmem>>, %arg5: memref<256x32xf32, #tpu.memory_space<vmem>>, %arg6: memref<8x1xf32, #tpu.memory_space<vmem>>, %arg7: memref<8x1xf32, #tpu.memory_space<vmem>>, %arg8: memref<8x1xf32, #tpu.memory_space<vmem>>, %arg9: memref<8x1xf32, #tpu.memory_space<vmem>>, %arg10: memref<8x1xf32, #tpu.memory_space<vmem>>, %arg11: memref<8x1xf32, #tpu.memory_space<vmem>>) attributes {dimension_semantics = [#tpu.dimension_semantics<parallel>, #tpu.dimension_semantics<arbitrary>, #tpu.dimension_semantics<arbitrary>], iteration_bounds = array<i64: 2, 1, 1>, scalar_prefetch = 0 : i64, scratch_operands = 4 : i64, tpu.core_type = #tpu.core_type<tc>, window_params = [{transform_indices = @transform_0, window_bounds = array<i64: 8, 1>}, {transform_indices = @transform_1, window_bounds = array<i64: 8, 32>}, {transform_indices = @transform_2, window_bounds = array<i64: 256, 32>}, {transform_indices = @transform_3, window_bounds = array<i64: 8, 1>}, {transform_indices = @transform_4, window_bounds = array<i64: 8, 1>}]} {
    %c0_i32 = arith.constant 0 : i32
    %0 = arith.cmpi eq, %arg1, %c0_i32 : i32
    %1 = arith.extui %0 : i1 to i32
    %c0_i32_0 = arith.constant 0 : i32
    %2 = arith.cmpi ne, %1, %c0_i32_0 : i32
    scf.if %2 {
      %cst_32 = arith.constant -1.000000e+30 : f32
      %49 = vector.broadcast %cst_32 : f32 to vector<8x1xf32>
      %c0_33 = arith.constant 0 : index
      %c0_34 = arith.constant 0 : index
      %50 = vector.load %arg8[%c0_33, %c0_34] : memref<8x1xf32, #tpu.memory_space<vmem>>, vector<8x1xf32>
      tpu.vector_store %arg8[%c0_33, %c0_34], %49 {strides = array<i32>} : memref<8x1xf32, #tpu.memory_space<vmem>>, vector<8x1xf32>,
      %cst_35 = arith.constant 0.000000e+00 : f32
      %51 = vector.broadcast %cst_35 : f32 to vector<8x1xf32>
      %c0_36 = arith.constant 0 : index
      %c0_37 = arith.constant 0 : index
      %52 = vector.load %arg9[%c0_36, %c0_37] : memref<8x1xf32, #tpu.memory_space<vmem>>, vector<8x1xf32>
      tpu.vector_store %arg9[%c0_36, %c0_37], %51 {strides = array<i32>} : memref<8x1xf32, #tpu.memory_space<vmem>>, vector<8x1xf32>,
      %cst_38 = arith.constant 0.000000e+00 : f32
      %53 = vector.broadcast %cst_38 : f32 to vector<8x1xf32>
      %c0_39 = arith.constant 0 : index
      %c0_40 = arith.constant 0 : index
      %54 = vector.load %arg10[%c0_39, %c0_40] : memref<8x1xf32, #tpu.memory_space<vmem>>, vector<8x1xf32>
      tpu.vector_store %arg10[%c0_39, %c0_40], %53 {strides = array<i32>} : memref<8x1xf32, #tpu.memory_space<vmem>>, vector<8x1xf32>,
      %cst_41 = arith.constant 0.000000e+00 : f32
      %55 = vector.broadcast %cst_41 : f32 to vector<8x1xf32>
      %c0_42 = arith.constant 0 : index
      %c0_43 = arith.constant 0 : index
      %56 = vector.load %arg11[%c0_42, %c0_43] : memref<8x1xf32, #tpu.memory_space<vmem>>, vector<8x1xf32>
      tpu.vector_store %arg11[%c0_42, %c0_43], %55 {strides = array<i32>} : memref<8x1xf32, #tpu.memory_space<vmem>>, vector<8x1xf32>,
    } else {
    }
    %c0 = arith.constant 0 : index
    %c0_1 = arith.constant 0 : index
    %3 = vector.load %arg4[%c0, %c0_1] : memref<8x32xf32, #tpu.memory_space<vmem>>, vector<8x32xf32>
    %c0_2 = arith.constant 0 : index
    %c0_3 = arith.constant 0 : index
    %4 = vector.load %arg5[%c0_2, %c0_3] : memref<256x32xf32, #tpu.memory_space<vmem>>, vector<256x32xf32>
    %cst = arith.constant dense<0.000000e+00> : vector<8x256xf32>
    %5 = tpu.matmul %3, %4, %cst {dimension_numbers = #tpu.dot_dimension_numbers<[1], [1], [0], [0], [0, 0, 1, 0], [], []>} : vector<8x32xf32>, vector<256x32xf32>, vector<8x256xf32> -> vector<8x256xf32>
    %cst_4 = arith.constant 1.42857146 : f32
    %6 = vector.broadcast %cst_4 : f32 to vector<8x256xf32>
    %7 = arith.mulf %5, %6 : vector<8x256xf32>
    %8 = tpu.iota {dimensions = array<i32: 1>} : vector<8x256xi32>
    %c0_5 = arith.constant 0 : index
    %c0_6 = arith.constant 0 : index
    %9 = vector.load %arg3[%c0_5, %c0_6] : memref<8x1xi32, #tpu.memory_space<vmem>>, vector<8x1xi32>
    %c256_i32 = arith.constant 256 : i32
    %10 = arith.muli %arg1, %c256_i32 : i32
    %11 = vector.broadcast %10 : i32 to vector<8x1xi32>
    %12 = arith.subi %9, %11 : vector<8x1xi32>
    %c0_7 = arith.constant 0 : index
    %c0_8 = arith.constant 0 : index
    %13 = vector.load %arg11[%c0_7, %c0_8] : memref<8x1xf32, #tpu.memory_space<vmem>>, vector<8x1xf32>
    %14 = vector.broadcast %12 : vector<8x1xi32> to vector<8x256xi32>
    %15 = arith.cmpi eq, %8, %14 : vector<8x256xi32>
    %cst_9 = arith.constant 0.000000e+00 : f32
    %16 = vector.broadcast %cst_9 : f32 to vector<8x256xf32>
    %17 = arith.select %15, %7, %16 : vector<8x256xi1>, vector<8x256xf32>
    %cst_10 = arith.constant dense<0.000000e+00> : vector<8xf32>
    %18 = vector.multi_reduction <add>, %17, %cst_10 [1] : vector<8x256xf32> to vector<8xf32>
    %19 = vector.shape_cast %18 : vector<8xf32> to vector<8x1xf32>
    %20 = arith.addf %13, %19 : vector<8x1xf32>
    %c0_11 = arith.constant 0 : index
    %c0_12 = arith.constant 0 : index
    %21 = vector.load %arg11[%c0_11, %c0_12] : memref<8x1xf32, #tpu.memory_space<vmem>>, vector<8x1xf32>
    tpu.vector_store %arg11[%c0_11, %c0_12], %20 {strides = array<i32>} : memref<8x1xf32, #tpu.memory_space<vmem>>, vector<8x1xf32>,
    %c0_13 = arith.constant 0 : index
    %c0_14 = arith.constant 0 : index
    %22 = vector.load %arg8[%c0_13, %c0_14] : memref<8x1xf32, #tpu.memory_space<vmem>>, vector<8x1xf32>
    %cst_15 = arith.constant dense<0xFF800000> : vector<8xf32>
    %23 = vector.multi_reduction <maximumf>, %7, %cst_15 [1] : vector<8x256xf32> to vector<8xf32>
    %24 = vector.shape_cast %23 : vector<8xf32> to vector<8x1xf32>
    %25 = arith.maximumf %22, %24 : vector<8x1xf32>
    %c0_16 = arith.constant 0 : index
    %c0_17 = arith.constant 0 : index
    %26 = vector.load %arg8[%c0_16, %c0_17] : memref<8x1xf32, #tpu.memory_space<vmem>>, vector<8x1xf32>
    %27 = arith.subf %26, %25 : vector<8x1xf32>
    %28 = math.exp %27 : vector<8x1xf32>
    %29 = vector.broadcast %25 : vector<8x1xf32> to vector<8x256xf32>
    %30 = arith.subf %7, %29 : vector<8x256xf32>
    %31 = math.exp %30 : vector<8x256xf32>
    %c0_18 = arith.constant 0 : index
    %c0_19 = arith.constant 0 : index
    %32 = vector.load %arg9[%c0_18, %c0_19] : memref<8x1xf32, #tpu.memory_space<vmem>>, vector<8x1xf32>
    %33 = arith.mulf %28, %32 : vector<8x1xf32>
    %cst_20 = arith.constant dense<0.000000e+00> : vector<8xf32>
    %34 = vector.multi_reduction <add>, %31, %cst_20 [1] : vector<8x256xf32> to vector<8xf32>
    %35 = vector.shape_cast %34 : vector<8xf32> to vector<8x1xf32>
    %36 = arith.addf %33, %35 : vector<8x1xf32>
    %c0_21 = arith.constant 0 : index
    %c0_22 = arith.constant 0 : index
    %37 = vector.load %arg9[%c0_21, %c0_22] : memref<8x1xf32, #tpu.memory_space<vmem>>, vector<8x1xf32>
    tpu.vector_store %arg9[%c0_21, %c0_22], %36 {strides = array<i32>} : memref<8x1xf32, #tpu.memory_space<vmem>>, vector<8x1xf32>,
    %c0_23 = arith.constant 0 : index
    %c0_24 = arith.constant 0 : index
    %38 = vector.load %arg10[%c0_23, %c0_24] : memref<8x1xf32, #tpu.memory_space<vmem>>, vector<8x1xf32>
    %39 = arith.mulf %28, %38 : vector<8x1xf32>
    %40 = arith.mulf %31, %7 : vector<8x256xf32>
    %cst_25 = arith.constant dense<0.000000e+00> : vector<8xf32>
    %41 = vector.multi_reduction <add>, %40, %cst_25 [1] : vector<8x256xf32> to vector<8xf32>
    %42 = vector.shape_cast %41 : vector<8xf32> to vector<8x1xf32>
    %43 = arith.addf %39, %42 : vector<8x1xf32>
    %c0_26 = arith.constant 0 : index
    %c0_27 = arith.constant 0 : index
    %44 = vector.load %arg10[%c0_26, %c0_27] : memref<8x1xf32, #tpu.memory_space<vmem>>, vector<8x1xf32>
    tpu.vector_store %arg10[%c0_26, %c0_27], %43 {strides = array<i32>} : memref<8x1xf32, #tpu.memory_space<vmem>>, vector<8x1xf32>,
    %c0_28 = arith.constant 0 : index
    %c0_29 = arith.constant 0 : index
    %45 = vector.load %arg8[%c0_28, %c0_29] : memref<8x1xf32, #tpu.memory_space<vmem>>, vector<8x1xf32>
    tpu.vector_store %arg8[%c0_28, %c0_29], %25 {strides = array<i32>} : memref<8x1xf32, #tpu.memory_space<vmem>>, vector<8x1xf32>,
    %c0_i32_30 = arith.constant 0 : i32
    %46 = arith.cmpi eq, %arg1, %c0_i32_30 : i32
    %47 = arith.extui %46 : i1 to i32
    %c0_i32_31 = arith.constant 0 : i32
    %48 = arith.cmpi ne, %47, %c0_i32_31 : i32
    scf.if %48 {
      %c0_32 = arith.constant 0 : index
      %c0_33 = arith.constant 0 : index
      %49 = vector.load %arg8[%c0_32, %c0_33] : memref<8x1xf32, #tpu.memory_space<vmem>>, vector<8x1xf32>
      %c0_34 = arith.constant 0 : index
      %c0_35 = arith.constant 0 : index
      %50 = vector.load %arg9[%c0_34, %c0_35] : memref<8x1xf32, #tpu.memory_space<vmem>>, vector<8x1xf32>
      %51 = math.log %50 : vector<8x1xf32>
      %52 = arith.addf %49, %51 : vector<8x1xf32>
      %c0_36 = arith.constant 0 : index
      %c0_37 = arith.constant 0 : index
      %53 = vector.load %arg9[%c0_36, %c0_37] : memref<8x1xf32, #tpu.memory_space<vmem>>, vector<8x1xf32>
      %54 = tpu.reciprocal %53 : vector<8x1xf32> -> vector<8x1xf32>
      %c0_38 = arith.constant 0 : index
      %c0_39 = arith.constant 0 : index
      %55 = vector.load %arg11[%c0_38, %c0_39] : memref<8x1xf32, #tpu.memory_space<vmem>>, vector<8x1xf32>
      %56 = arith.subf %55, %52 : vector<8x1xf32>
      %c0_40 = arith.constant 0 : index
      %c0_41 = arith.constant 0 : index
      %57 = vector.load %arg6[%c0_40, %c0_41] : memref<8x1xf32, #tpu.memory_space<vmem>>, vector<8x1xf32>
      tpu.vector_store %arg6[%c0_40, %c0_41], %56 {strides = array<i32>} : memref<8x1xf32, #tpu.memory_space<vmem>>, vector<8x1xf32>,
      %c0_42 = arith.constant 0 : index
      %c0_43 = arith.constant 0 : index
      %58 = vector.load %arg10[%c0_42, %c0_43] : memref<8x1xf32, #tpu.memory_space<vmem>>, vector<8x1xf32>
      %59 = arith.mulf %58, %54 : vector<8x1xf32>
      %60 = arith.subf %52, %59 : vector<8x1xf32>
      %c0_44 = arith.constant 0 : index
      %c0_45 = arith.constant 0 : index
      %61 = vector.load %arg7[%c0_44, %c0_45] : memref<8x1xf32, #tpu.memory_space<vmem>>, vector<8x1xf32>
      tpu.vector_store %arg7[%c0_44, %c0_45], %60 {strides = array<i32>} : memref<8x1xf32, #tpu.memory_space<vmem>>, vector<8x1xf32>,
    } else {
    }
    return
  }
  func.func @transform_0(%arg0: i32, %arg1: i32, %arg2: i32) -> (i32, i32) {
    %c0_i32 = arith.constant 0 : i32
    %c0_i32_0 = arith.constant 0 : i32
    return %arg0, %c0_i32 : i32, i32
  }
  func.func @transform_1(%arg0: i32, %arg1: i32, %arg2: i32) -> (i32, i32) {
    %c0_i32 = arith.constant 0 : i32
    return %arg0, %arg2 : i32, i32
  }
  func.func @transform_2(%arg0: i32, %arg1: i32, %arg2: i32) -> (i32, i32) {
    %c0_i32 = arith.constant 0 : i32
    return %arg1, %arg2 : i32, i32
  }
  func.func @transform_3(%arg0: i32, %arg1: i32, %arg2: i32) -> (i32, i32) {
    %c0_i32 = arith.constant 0 : i32
    %c0_i32_0 = arith.constant 0 : i32
    return %arg0, %c0_i32 : i32, i32
  }
  func.func @transform_4(%arg0: i32, %arg1: i32, %arg2: i32) -> (i32, i32) {
    %c0_i32 = arith.constant 0 : i32
    %c0_i32_0 = arith.constant 0 : i32
    return %arg0, %c0_i32 : i32, i32
  }
}

</mosaic_0001>

<bundles_post_ra>
// kernel: squeeze.3
= control target key start
LH: loop header
LB: loop body
LE: loop exit
PB: predicated region body
PF: predicated region fallthrough
CT: control target
= control target key end

     0   :  { %s85_s0 = inlined_call_operand.vmem [shape: f32[16], index: 0, kind: input, shape index: {}]   ;;  %s86_s1 = inlined_call_operand.hbm [shape: f32[2,8], index: 1, kind: output, shape index: {}]  }
   0x1   :  { %v5_v0 = vld [vmem:[%s85_s0] sm:$0x1] }
   0x2   :  { %2 = vsyncpa [#allocation1], 0  ;;  %6 = vst [vmem:[#allocation3] sm:$0x1] %v5_v0  ;;  %vm8_vm0 = vcmask 64512   ;;  %s58_s0 = smov 120  }
   0x3   :  { %s59_s8 = smov [#allocation0]  }
   0x4   :  { %s26_s9 = sshll.u32 %s59_s8, 4  ;;  %s27_s9 = int_to_ptr.vmem [resolvable:$true] %s26_s9 }
   0x5   :  { %s34_s10 = scalar_lea.vmem %s27_s9, 32  ;;  %p39_p1 = scmp.lt.s32.totalorder %s27_s9, %s27_s9 }
   0x6   :  { %p35_p0 = scmp.ne.s32.totalorder %s27_s9, %s34_s10  ;;  %p40_p2 = scmp.lt.s32.totalorder %s34_s10, %s34_s10 }
   0x8   :  { %p41_p3 = por %p40_p2, %p39_p1 }
   0x9   :  { %v10_v1 = vld [vmem:[#allocation3] sm:$0x1]  }
   0xa   :  { %v7_v2 = vld [vmem:[#allocation3] sm:$0x1]   ;;  %11 = vrot.lane.b32.xlu0 %v10_v1, %s58_s0  ;;  %p42_p4 = pnand %p41_p3, %p35_p0 }
   0xb   :  { %9 = vst.msk [vmem:[#allocation2] sm:$0x1] %vm8_vm0, %v7_v2  }
  0x7c   :  { %v12_v3 = vpop.permute.xlu0 %11  }
  0x7d   :  { %15 = vst.msk [vmem:[#allocation2 + $0x1] sm:$0x1] %vm8_vm0, %v12_v3  }
  0x84   :  { %v19_v4 = vld [vmem:[#allocation2] sm:$0x3] }
  0x85   :  { %21 = vst [vmem:[#allocation0] sm:$0x3] %v19_v4 }
  0x86   :  { %45 = shalt.err (!%p42_p4)
}
  0x87   :  { %s46_s13 = scalar_lea.hbm %s86_s1, 32 }
  0x88   :  { %p47_p5 = scmp.ne.s32.totalorder %s86_s1, %s46_s13  ;;  %p50_p6 = scmp.lt.u32.totalorder %s46_s13, %s86_s1 }
  0x8a   :  { %p52_p7 = pnand %p50_p6, %p47_p5 }
  0x8c   :  { %55 = shalt.err (!%p52_p7)
}
  0x8d   :  { %29 = dma.vmem_to_hbm [thread:$0]  %s27_s9, 32, %s86_s1, [#allocation1]  }
  0x8e   :  { %56 = dma.done.wait [#allocation1], 32  }
  0x8f   :  { %57 = vsyncadd [#allocation1], 4294967264 }
  0x90   :  { %31 = vsyncpa [#allocation1], 1 }

// kernel: fused_linear_for_ppo.1
= control target key start
LH: loop header
LB: loop body
LE: loop exit
PB: predicated region body
PF: predicated region fallthrough
CT: control target
= control target key end

     0   :  { %s919_s15 = smov 0   ;;  %s921_s16 = smov 0   ;;  %s1110_s0 = inlined_call_operand.vmem [shape: s32[16,1], index: 0, kind: input, shape index: {}]   ;;  %s1111_s1 = inlined_call_operand.vmem [shape: f32[16,32], index: 1, kind: input, shape index: {}]   ;;  %s1112_s2 = inlined_call_operand.vmem [shape: f32[256,32], index: 2, kind: input, shape index: {}]   ;;  %s1113_s3 = inlined_call_operand.vmem [shape: f32[16,1], index: 3, kind: output, shape index: {0}]   ;;  %s1114_s4 = inlined_call_operand.vmem [shape: f32[16,1], index: 4, kind: output, shape index: {1}]  }
   0x1   :  { %s923_s17 = smov 0  }
   0x2 LB: > { %s34_s18 = sadd.s32 1, %s885_s16  ;;  %p706_p0 = scmp.ge.s32.totalorder %s889_s17, 1  ;;  %s889_s17 = sphi %s923_s17, %s15_s17   ;;  %s885_s16 = sphi %s921_s16, %s1118_s16   ;;  %s881_s15 = sphi %s919_s15, %s1117_s15  }
   0x3   : > { %p36_p1 = scmp.ge.s32.totalorder %s34_s18, 2  ;;  %p213_p2 = scmp.lt.s32.totalorder %s889_s17, 3 }
   0x5   : > { %s1120_s18 = smov (%p36_p1, %s34_s18), 0  ;;  %p214_p3 = pnand %p706_p0, %p213_p2 }
   0x6   : > { %v310_v0 = vld [vmem:[%s1112_s2 + $0x80] sm:$0xff] (!%p214_p3)  ;;  %v311_v1 = vld [vmem:[%s1112_s2 + $0x88] sm:$0xff] (!%p214_p3)  ;;  %vm326_vm0 = vcmask (!%p214_p3), 261120   ;;  %p256_p4 = scmp.lt.s32.totalorder (!%p214_p3), %s881_s15, 1  ;;  %v312_v6 = vld [vmem:[%s1112_s2 + $0x90] sm:$0xff] (!%p214_p3)  ;;  %v891_v7 = vmov (!%p214_p3), 0   ;;  %v499_v4 = vlaneseq (!%p214_p3) }
   0x7   : > { %217 = sbr.rel (%p214_p3) target bundleno = 750 (0x2ee), region = 32  ;;  %v294_v2 = vld [vmem:[%s1112_s2] sm:$0xff] (!%p214_p3)  ;;  %v780_v3 = vpack.c.bf16 (!%p214_p3), %v311_v1, %v310_v0  ;;  %vm948_vm1 = vmpackc.low (!%p214_p3), %vm326_vm0, %vm326_vm0  ;;  %v295_v5 = vld [vmem:[%s1112_s2 + $0x8] sm:$0xff] (!%p214_p3)  ;;  %856 = vset.pattern.permute.xlu1 (!%p214_p3), %v891_v7  ;;  %855 = vset.pattern.permute.xlu0 (!%p214_p3), %v891_v7  ;;  %vm288_vm2 = vcmask (!%p214_p3), 7168   ;;  %v892_v52 = vmov (!%p214_p3), -1e+30  }
   0x8   : > { %v783_v8 = vpack.c.bf16 (!%p214_p3), %v295_v5, %v294_v2  ;;  %v313_v9 = vld [vmem:[%s1112_s2 + $0x98] sm:$0xff] (!%p214_p3)  ;;  %v296_v11 = vld [vmem:[%s1112_s2 + $0x10] sm:$0xff] (!%p214_p3)  ;;  %v314_v13 = vld [vmem:[%s1112_s2 + $0xa0] sm:$0xff] (!%p214_p3)  ;;  %289 = vst.msk [vmem:[#allocation2] sm:$0xff] (!%p214_p3), %vm288_vm2, %v892_v52  ;;  %v893_v58 = vmov (!%p214_p3), 0.0   ;;  %v500_v5 = vand.u32 (!%p214_p3), 127, %v499_v4 }
   0x9   : > { %782 = vmatprep.subr.msk.bf16.mxu0 (!%p214_p3), %vm948_vm1, %v780_v3  ;;  %v786_v10 = vpack.c.bf16 (!%p214_p3), %v313_v9, %v312_v6  ;;  %v297_v12 = vld [vmem:[%s1112_s2 + $0x18] sm:$0xff] (!%p214_p3)  ;;  %v315_v14 = vld [vmem:[%s1112_s2 + $0xa8] sm:$0xff] (!%p214_p3)  ;;  %v298_v19 = vld [vmem:[%s1112_s2 + $0x20] sm:$0xff] (!%p214_p3)  ;;  %290 = vst.msk [vmem:[#allocation3] sm:$0xff] (!%p214_p3), %vm288_vm2, %v893_v58 }
   0xa   : > { %785 = vmatpush3.bf16.xpose.msk.msra.mxu0 (!%p214_p3), %vm948_vm1, %v783_v8  ;;  %v789_v15 = vpack.c.bf16 (!%p214_p3), %v297_v12, %v296_v11  ;;  %v792_v16 = vpack.c.bf16 (!%p214_p3), %v315_v14, %v314_v13  ;;  %v299_v20 = vld [vmem:[%s1112_s2 + $0x28] sm:$0xff] (!%p214_p3)  ;;  %v316_v21 = vld [vmem:[%s1112_s2 + $0xb0] sm:$0xff] (!%p214_p3)  ;;  %v317_v22 = vld [vmem:[%s1112_s2 + $0xb8] sm:$0xff] (!%p214_p3)  ;;  %291 = vst.msk [vmem:[#allocation4] sm:$0xff] (!%p214_p3), %vm288_vm2, %v893_v58  ;;  %v501_v7 = vadd.s32 (!%p214_p3), 128, %v500_v5 }
   0xb   : > { %788 = vmatprep.subr.msk.bf16.mxu0 (!%p214_p3), %vm948_vm1, %v786_v10  ;;  %v795_v23 = vpack.c.bf16 (!%p214_p3), %v299_v20, %v298_v19  ;;  %v798_v24 = vpack.c.bf16 (!%p214_p3), %v317_v22, %v316_v21  ;;  %v300_v25 = vld [vmem:[%s1112_s2 + $0x30] sm:$0xff] (!%p214_p3)  ;;  %v301_v26 = vld [vmem:[%s1112_s2 + $0x38] sm:$0xff] (!%p214_p3)  ;;  %v318_v27 = vld [vmem:[%s1112_s2 + $0xc0] sm:$0xff] (!%p214_p3)  ;;  %292 = vst.msk [vmem:[#allocation5] sm:$0xff] (!%p214_p3), %vm288_vm2, %v893_v58 }
   0xc   : > { %v319_v28 = vld [vmem:[%s1112_s2 + $0xc8] sm:$0xff] (!%p214_p3)  ;;  %v801_v29 = vpack.c.bf16 (!%p214_p3), %v301_v26, %v300_v25  ;;  %v302_v31 = vld [vmem:[%s1112_s2 + $0x40] sm:$0xff] (!%p214_p3)  ;;  %v320_v33 = vld [vmem:[%s1112_s2 + $0xd0] sm:$0xff] (!%p214_p3) }
   0xd   : > { %v804_v30 = vpack.c.bf16 (!%p214_p3), %v319_v28, %v318_v27  ;;  %v303_v32 = vld [vmem:[%s1112_s2 + $0x48] sm:$0xff] (!%p214_p3)  ;;  %v321_v34 = vld [vmem:[%s1112_s2 + $0xd8] sm:$0xff] (!%p214_p3)  ;;  %v304_v37 = vld [vmem:[%s1112_s2 + $0x50] sm:$0xff] (!%p214_p3) }
   0xe   : > { %s1122_s15 = smov (!%p256_p4, %s881_s15), 1  ;;  %v807_v35 = vpack.c.bf16 %v303_v32, %v302_v31  ;;  %v810_v36 = vpack.c.bf16 %v321_v34, %v320_v33  ;;  %v305_v38 = vld [vmem:[%s1112_s2 + $0x58] sm:$0xff]  ;;  %v322_v39 = vld [vmem:[%s1112_s2 + $0xe0] sm:$0xff]  ;;  %v323_v40 = vld [vmem:[%s1112_s2 + $0xe8] sm:$0xff] }
   0xf   : > { %s973_s9 = sshll.u32 %s1122_s15, 3  ;;  %v813_v41 = vpack.c.bf16 %v305_v38, %v304_v37  ;;  %v816_v42 = vpack.c.bf16 %v323_v40, %v322_v39  ;;  %v306_v43 = vld [vmem:[%s1112_s2 + $0x60] sm:$0xff]  ;;  %v307_v44 = vld [vmem:[%s1112_s2 + $0x68] sm:$0xff]  ;;  %v324_v45 = vld [vmem:[%s1112_s2 + $0xf0] sm:$0xff] }
  0x10   : > { %s266_s20 = scalar_lea.vmem %s1111_s1, %s973_s9  ;;  %s259_s15 = scalar_lea.vmem %s1110_s0, %s973_s9  ;;  %v325_v46 = vld [vmem:[%s1112_s2 + $0xf8] sm:$0xff]  ;;  %v819_v47 = vpack.c.bf16 %v307_v44, %v306_v43  ;;  %v308_v49 = vld [vmem:[%s1112_s2 + $0x70] sm:$0xff]  ;;  %v520_v59 = vld [vmem:[#allocation2] sm:$0xff] }
  0x11   : > { %v293_v17 = vld [vmem:[%s266_s20] sm:$0xff]  ;;  %v822_v48 = vpack.c.bf16 %v325_v46, %v324_v45  ;;  %v309_v50 = vld [vmem:[%s1112_s2 + $0x78] sm:$0xff]  ;;  %v539_v19 = vld [vmem:[#allocation3] sm:$0xff]  ;;  %s279_s25 = scalar_lea.vmem %s1113_s3, %s973_s9  ;;  %s283_s28 = scalar_lea.vmem %s1114_s4, %s973_s9 }
  0x12   : > { %v502_v18 = vld [vmem:[%s259_s15] sm:$0xff]  ;;  %791 = vmatpush3.bf16.xpose.msk.msra.mxu0 %vm948_vm1, %v789_v15  ;;  %778 = vmatprep.mubr.msk.f32.mxu0 %vm326_vm0, %v293_v17  ;;  %v825_v51 = vpack.c.bf16 %v309_v50, %v308_v49  ;;  %v546_v22 = vld [vmem:[#allocation4] sm:$0xff]  ;;  %v506_v27 = vld [vmem:[#allocation5] sm:$0xff] }
  0x13   : > { %794 = vmatprep.subr.msk.bf16.mxu0 %vm948_vm1, %v792_v16  ;;  %508 = vperm.xlu1 %856, %v502_v18  }
  0x1a   : > { %797 = vmatpush3.bf16.xpose.msk.msra.mxu0 %vm948_vm1, %v795_v23 }
  0x1b   : > { %800 = vmatprep.subr.msk.bf16.mxu0 %vm948_vm1, %v798_v24 }
  0x22   : > { %803 = vmatpush3.bf16.xpose.msk.msra.mxu0 %vm948_vm1, %v801_v29 }
  0x23   : > { %806 = vmatprep.subr.msk.bf16.mxu0 %vm948_vm1, %v804_v30 }
  0x2a   : > { %809 = vmatpush3.bf16.xpose.msk.msra.mxu0 %vm948_vm1, %v807_v35 }
  0x2b   : > { %812 = vmatprep.subr.msk.bf16.mxu0 %vm948_vm1, %v810_v36 }
  0x32   : > { %815 = vmatpush3.bf16.xpose.msk.msra.mxu0 %vm948_vm1, %v813_v41 }
  0x33   : > { %818 = vmatprep.subr.msk.bf16.mxu0 %vm948_vm1, %v816_v42 }
  0x3a   : > { %821 = vmatpush3.bf16.xpose.msk.msra.mxu0 %vm948_vm1, %v819_v47 }
  0x3b   : > { %824 = vmatprep.subr.msk.bf16.mxu0 %vm948_vm1, %v822_v48 }
  0x42   : > { %827 = vmatpush3.bf16.xpose.msk.msra.mxu0 %vm948_vm1, %v825_v51 }
  0x49   : > { %779 = vmatmul.mubr.msk.f32.vlgmr.msra.gmra.mrb[0].mxu0 %vm326_vm0, %v293_v17 }
  0x92   : > { %v509_v9 = vpop.permute.xlu1 %508 }
  0x93   : > { %vm510_vm3 = vcmp.eq.s32.totalorder %v500_v5, %v509_v9  ;;  %vm511_vm4 = vcmp.eq.s32.totalorder %v501_v7, %v509_v9 }
 0x11c   : > { %v492_v53 = vpop.f32.mrb[0].mxu0 }
 0x11d   : > { %v497_v54 = vmul.f32 1.4285715, %v492_v53  ;;  %v494_v55 = vpop.f32.mrb[1].mxu0 }
 0x11e   : > { %v498_v56 = vmul.f32 1.4285715, %v494_v55 }
 0x11f   : > { %v512_v14 = vsel %vm510_vm3, %v497_v54, 0.0 }
 0x120   : > { %v521_v57 = vmax.f32 %v497_v54, %v498_v56  ;;  %v513_v15 = vsel %vm511_vm4, %v498_v56, 0.0 }
 0x121   : > { %v514_v16 = vadd.f32 %v513_v15, %v512_v14 }
 0x122   : > { %522 = vmax.xlane.f32.xlu0 %v521_v57 }
 0x1af   : > { %v523_v60 = vpop.xlane.xlu0 %522 }
 0x1b0   : > { %v524_v61 = vmax.f32 %v520_v59, %v523_v60 }
 0x1b2   : > { %v525_v62 = vsub.f32 %v520_v59, %v524_v61  ;;  %555 = vst.msk [vmem:[#allocation2] sm:$0xff] %vm288_vm2, %v524_v61  ;;  %530 = vperm.xlu0 %855, %v524_v61  }
 0x1b4   : > { %v526_v17 = vmul.f32 1.442695, %v525_v62 }
 0x1b9   : > { %v559_v34 = vld [vmem:[#allocation2] sm:$0xff] }
 0x231   : > { %v531_v63 = vpop.permute.xlu0 %530 }
 0x232   : > { %v533_v0 = vsub.f32 %v497_v54, %v531_v63  ;;  %v534_v1 = vsub.f32 %v498_v56, %v531_v63 }
 0x234   : > { %v535_v2 = vmul.f32 1.442695, %v533_v0  ;;  %v537_v3 = vmul.f32 1.442695, %v534_v1 }
 0x236   : > { %857 = vpow2.f32 %v535_v2 }
 0x237   : > { %859 = vpow2.f32 %v537_v3 }
 0x238   : > { %861 = vpow2.f32 %v526_v17 }
 0x240   : > { %v858_v6 = vpop.eup %857 }
 0x241   : > { %v860_v8 = vpop.eup %859  ;;  %v548_v11 = vmul.f32 %v858_v6, %v497_v54 }
 0x242   : > { %v541_v10 = vadd.f32 %v860_v8, %v858_v6  ;;  %v549_v12 = vmul.f32 %v860_v8, %v498_v56  ;;  %v862_v18 = vpop.eup %861 }
 0x243   : > { %v540_v20 = vmul.f32 %v862_v18, %v539_v19  ;;  %v547_v24 = vmul.f32 %v862_v18, %v546_v22 }
 0x244   : > { %542 = vadd.xlane.f32.xlu1 %v541_v10  ;;  %v550_v13 = vadd.f32 %v549_v12, %v548_v11 }
 0x248   : > { %551 = vadd.xlane.f32.xlu1 %v550_v13 }
 0x24c   : > { %515 = vadd.xlane.f32.xlu1 %v514_v16 }
 0x2d1   : > { %v543_v21 = vpop.xlane.xlu1 %542 }
 0x2d2   : > { %v544_v23 = vadd.f32 %v543_v21, %v540_v20 }
 0x2d4   : > { %545 = vst.msk [vmem:[#allocation3] sm:$0xff] %vm288_vm2, %v544_v23 }
 0x2d5   : > { %v552_v25 = vpop.xlane.xlu1 %551 }
 0x2d6   : > { %v553_v26 = vadd.f32 %v552_v25, %v547_v24 }
 0x2d8   : > { %554 = vst.msk [vmem:[#allocation4] sm:$0xff] %vm288_vm2, %v553_v26 }
 0x2d9   : > { %v516_v28 = vpop.xlane.xlu1 %515 }
 0x2da   : > { %v517_v29 = vadd.f32 %v516_v28, %v506_v27 }
 0x2db   : > { %v560_v30 = vld [vmem:[#allocation3] sm:$0xff] }
 0x2dc   : > { %863 = vlog2.f32 %v560_v30  ;;  %519 = vst.msk [vmem:[#allocation5] sm:$0xff] %vm288_vm2, %v517_v29 }
 0x2dd   : > { %865 = vrcp.f32 %v560_v30 }
 0x2df   : > { %v568_v35 = vld [vmem:[#allocation4] sm:$0xff] }
 0x2e3   : > { %v565_v38 = vld [vmem:[#allocation5] sm:$0xff] }
 0x2e6   : > { %v864_v31 = vpop.eup %863 }
 0x2e7   : > { %v866_v32 = vpop.eup %865  ;;  %v562_v33 = vmul.f32 0.6931472, %v864_v31 }
 0x2e8   : > { %v569_v36 = vmul.f32 %v866_v32, %v568_v35 }
 0x2e9   : > { %v563_v37 = vadd.f32 %v562_v33, %v559_v34 }
 0x2eb   : > { %v570_v39 = vsub.f32 %v563_v37, %v569_v36  ;;  %v566_v40 = vsub.f32 %v565_v38, %v563_v37 }
 0x2ed   : > { %571 = vst.msk [vmem:[%s283_s28] sm:$0xff] %vm288_vm2, %v570_v39  ;;  %567 = vst.msk [vmem:[%s279_s25] sm:$0xff] %vm288_vm2, %v566_v40 }
 0x2ee PF: > { %s15_s17 = sadd.s32 1, %s889_s17   ;;  %s1117_s15 = smov %s885_s16 }
 0x2ef   : > { %p12_p5 = scmp.ge.s32.totalorder %s15_s17, 4   ;;  %s1118_s16 = smov %s1120_s18 }
 0x2f1   :  { %14 = sbr.rel (!%p12_p5) target bundleno = 2 (0x2), region = 88 }

</bundles_post_ra>
